<compile_context>
chip_gen: v7x
topology: tpu7x:2x2x1
jax: 0.10.0
libtpu: 0.0.40
codegen_flags: <defaults>
</compile_context>

<pallas_src>
import functools

import jax
import jax.numpy as jnp
from jax import lax
from jax.experimental import pallas as pl
from jax.experimental.pallas import tpu as pltpu

LANES = 128
# Double-buffered input-tile budget (2 inputs x 2 buffers).  16 MiB fits every
# generation once vmem_limit_bytes is raised to 32 MiB (v5e scoped default is 16 MiB,
# v6e/v7x 32 MiB; all far below physical VMEM, incl. v7x's 64 MiB).
VMEM_INPUT_BUDGET = 16 * 1024 * 1024
VMEM_LIMIT_BYTES = 32 * 1024 * 1024
MAX_BLOCK_R = 16384  # absolute row cap (only reached for 1-2 byte streams)


def _sublane_packing(dtype):
    """Sublane packing for a dtype: 8 (4-byte), 16 (2-byte), 32 (1-byte)."""
    return 8 * max(1, 4 // jnp.dtype(dtype).itemsize)


def _dice_bce_partials_kernel(logits_ref, targets_ref, out_ref, *,
                              needs_tail, tail_rem):
    """Per-lane partial sums for this tile: out[i] = [sum(bce), sum(p*t), sum(p+t)]."""
    i = pl.program_id(0)

    x = logits_ref[...].astype(jnp.float32)
    t = targets_ref[...].astype(jnp.float32)

    # Share one transcendental chain:  e = exp(-|x|),  s = 1 + e.
    #   bce = max(x, 0) - x*t + log(s)      (== log1p(e); s in (1,2] so log(s) is exact enough)
    #   p   = sigmoid(x) = 1/s  if x >= 0  else  e/s
    e = jnp.exp(-jnp.abs(x))
    s = 1.0 + e
    inv = 1.0 / s  # exact divide (pl.reciprocal(approx=True) would add ~1e-3 rel error)
    bce = jnp.maximum(x, 0.0) - x * t + jnp.log(s)
    p = jnp.where(x >= 0.0, inv, e * inv)

    def write(bce_v, p_v, t_v):
        # Lane-wise partial sums; (num_blocks, 3, 128) combine happens in the wrapper.
        # (If a v7x bundle dump shows VALU binding, these row-sums could move to the MXU.)
        out_ref[0, 0, :] = jnp.sum(bce_v, axis=0)
        out_ref[0, 1, :] = jnp.sum(p_v * t_v, axis=0)
        out_ref[0, 2, :] = jnp.sum(p_v + t_v, axis=0)

    if needs_tail:  # Python-static: only traced when the last tile is ragged.
        last = pl.num_programs(0) - 1

        @pl.when(i == last)
        def _tail():
            # Local linear index inside this tile; tail_rem is a static Python int
            # (<= block_r*128), so no i*block_r*128 int32 overflow on huge inputs.
            row = lax.broadcasted_iota(jnp.int32, x.shape, 0)
            col = lax.broadcasted_iota(jnp.int32, x.shape, 1)
            valid = row * LANES + col < tail_rem
            # Use where (not multiply): rows past the array end may hold garbage/NaN.
            write(jnp.where(valid, bce, 0.0),
                  jnp.where(valid, p, 0.0),
                  jnp.where(valid, t, 0.0))

        @pl.when(i != last)
        def _full():
            write(bce, p, t)
    else:
        write(bce, p, t)


def dice_bce_from_logits(logits, targets, *, bce_weight=0.5, dice_weight=0.5,
                         smooth=1e-6):
    """Combined BCE-with-logits + Dice loss (pos_weight=None case of the PyTorch module)."""
    # TODO(synk): pos_weight (defaults to None in the PyTorch module) is not implemented.

    def _prep(a):
        a = jnp.asarray(a)
        dt = a.dtype
        if dt == jnp.bool_:
            a = a.astype(jnp.int8)                 # 1-byte stream; upcast in-kernel
        elif jnp.issubdtype(dt, jnp.floating):
            if dt.itemsize > 4:
                a = a.astype(jnp.float32)          # f64 -> f32; bf16/f16/f32 kept as-is
        elif jnp.issubdtype(dt, jnp.integer):
            if dt.itemsize > 4:
                a = a.astype(jnp.int32)            # i64 -> i32; i8/i16/i32 kept as-is
        else:
            a = a.astype(jnp.float32)
        return a.reshape(-1)

    x = _prep(logits)
    t = _prep(targets)
    n = x.shape[0]

    # Lane alignment.  NOTE: unaligned element counts (n % 128 != 0) pay a full-array
    # pad/copy through HBM; the in-kernel tail mask then zeroes the pad contribution.
    pad = (-n) % LANES
    if pad:
        x = jnp.pad(x, (0, pad))
        t = jnp.pad(t, (0, pad))
    rows = (n + pad) // LANES

    packing = max(_sublane_packing(x.dtype), _sublane_packing(t.dtype))
    row_bytes = LANES * (x.dtype.itemsize + t.dtype.itemsize)

    # Largest tile that keeps the double-buffered input footprint under budget.
    cap_rows = VMEM_INPUT_BUDGET // (2 * row_bytes)
    cap_rows = max(packing, (cap_rows // packing) * packing)
    cap_rows = min(cap_rows, MAX_BLOCK_R)

    # Aim for >= 2 blocks (v7x megacore) when the input is big enough to split.
    half = -(-rows // 2)                       # cdiv(rows, 2)
    half = -(-half // packing) * packing       # round up to sublane packing
    block_r = min(cap_rows, half)
    if block_r >= rows:
        block_r = rows  # single full-extent block (exempt from (8,128) divisibility)

    num_blocks = pl.cdiv(rows, block_r)
    needs_tail = (num_blocks * block_r * LANES) != n
    tail_rem = n - (num_blocks - 1) * block_r * LANES  # static, fits int32 in-kernel

    x2 = x.reshape(rows, LANES)
    t2 = t.reshape(rows, LANES)

    kernel = functools.partial(_dice_bce_partials_kernel,
                               needs_tail=needs_tail, tail_rem=tail_rem)

    partials = pl.pallas_call(
        kernel,
        out_shape=jax.ShapeDtypeStruct((num_blocks, 3, LANES), jnp.float32),
        grid_spec=pltpu.PrefetchScalarGridSpec(
            num_scalar_prefetch=0,
            grid=(num_blocks,),
            in_specs=[
                pl.BlockSpec((block_r, LANES), lambda i: (i, 0)),
                pl.BlockSpec((block_r, LANES), lambda i: (i, 0)),
            ],
            out_specs=pl.BlockSpec((1, 3, LANES), lambda i: (i, 0, 0)),
        ),
        compiler_params=pltpu.CompilerParams(
            dimension_semantics=("parallel",),
            vmem_limit_bytes=VMEM_LIMIT_BYTES),
    )(x2, t2)

    # Tiny final combine in plain JAX (also what keeps the grid axis fully parallel).
    sums = jnp.sum(partials, axis=(0, 2))  # [bce_sum, intersection, p_sum + t_sum]
    bce_mean = sums[0] / jnp.float32(n)
    dice = (2.0 * sums[1] + smooth) / (sums[2] + smooth)
    return bce_weight * bce_mean + dice_weight * (1.0 - dice)


def _reference(logits, targets, bce_weight=0.5, dice_weight=0.5, smooth=1e-6):
    x = jnp.asarray(logits).astype(jnp.float32).reshape(-1)
    t = jnp.asarray(targets).astype(jnp.float32).reshape(-1)
    bce = jnp.mean(jnp.maximum(x, 0.0) - x * t + jnp.log1p(jnp.exp(-jnp.abs(x))))
    p = jax.nn.sigmoid(x)
    inter = jnp.sum(p * t)
    dice = (2.0 * inter + smooth) / (jnp.sum(p) + jnp.sum(t) + smooth)
    return bce_weight * bce + dice_weight * (1.0 - dice)


if __name__ == "__main__":
    key = jax.random.PRNGKey(0)
    k1, k2, k3, k4 = jax.random.split(key, 4)

    # Main case: NCHW f32 logits from a segmentation head (lane-aligned element count).
    logits = jax.random.normal(k1, (2, 4, 16, 16), dtype=jnp.float32) * 2.0
    targets = (jax.random.uniform(k2, (2, 4, 16, 16)) > 0.5).astype(jnp.float32)
    loss = dice_bce_from_logits(logits, targets)
    jax.block_until_ready(loss)
    ref = _reference(logits, targets)
    assert jnp.allclose(loss, ref, rtol=1e-5, atol=1e-5), (loss, ref)

    # Tail case: element count not lane/tile aligned, exercises the in-kernel mask path.
    logits2 = jax.random.normal(k3, (1, 1, 25, 40), dtype=jnp.float32)
    targets2 = (jax.random.uniform(k4, (1, 1, 25, 40)) > 0.5).astype(jnp.float32)
    loss2 = dice_bce_from_logits(logits2, targets2)
    jax.block_until_ready(loss2)
    ref2 = _reference(logits2, targets2)
    assert jnp.allclose(loss2, ref2, rtol=1e-5, atol=1e-5), (loss2, ref2)

    # Mixed low-precision case: bf16 logits + bool mask streamed as bf16/int8.
    logits3 = (jax.random.normal(k1, (2, 4, 16, 16)) * 2.0).astype(jnp.bfloat16)
    targets3 = jax.random.uniform(k2, (2, 4, 16, 16)) > 0.5  # bool
    loss3 = dice_bce_from_logits(logits3, targets3)
    jax.block_until_ready(loss3)
    ref3 = _reference(logits3, targets3)
    assert jnp.allclose(loss3, ref3, rtol=1e-4, atol=1e-5), (loss3, ref3)

    print("KERNEL_OK")
</pallas_src>

<mosaic_0001>
module attributes {stable_mosaic.version = 11 : i64} {
  func.func @_dice_bce_partials_kernel(%arg0: i32, %arg1: memref<8x128xf32, #tpu.memory_space<vmem>>, %arg2: memref<8x128xf32, #tpu.memory_space<vmem>>, %arg3: memref<1x3x128xf32, #tpu.memory_space<vmem>>) attributes {dimension_semantics = [#tpu.dimension_semantics<parallel>], iteration_bounds = array<i64: 2>, scalar_prefetch = 0 : i64, scratch_operands = 0 : i64, tpu.core_type = #tpu.core_type<tc>, window_params = [{transform_indices = @transform_0, window_bounds = array<i64: 8, 128>}, {transform_indices = @transform_1, window_bounds = array<i64: 8, 128>}, {transform_indices = @transform_2, window_bounds = array<i64: 1, 3, 128>}]} {
    %c0 = arith.constant 0 : index
    %c0_0 = arith.constant 0 : index
    %0 = vector.load %arg1[%c0, %c0_0] : memref<8x128xf32, #tpu.memory_space<vmem>>, vector<8x128xf32>
    %c0_1 = arith.constant 0 : index
    %c0_2 = arith.constant 0 : index
    %1 = vector.load %arg2[%c0_1, %c0_2] : memref<8x128xf32, #tpu.memory_space<vmem>>, vector<8x128xf32>
    %2 = math.absf %0 : vector<8x128xf32>
    %cst = arith.constant 0.000000e+00 : f32
    %3 = vector.broadcast %cst : f32 to vector<8x128xf32>
    %4 = arith.subf %3, %2 : vector<8x128xf32>
    %5 = math.exp %4 : vector<8x128xf32>
    %cst_3 = arith.constant 1.000000e+00 : f32
    %6 = vector.broadcast %cst_3 : f32 to vector<8x128xf32>
    %7 = arith.addf %6, %5 : vector<8x128xf32>
    %cst_4 = arith.constant 1.000000e+00 : f32
    %8 = vector.broadcast %cst_4 : f32 to vector<8x128xf32>
    %9 = arith.divf %8, %7 : vector<8x128xf32>
    %cst_5 = arith.constant 0.000000e+00 : f32
    %10 = vector.broadcast %cst_5 : f32 to vector<8x128xf32>
    %11 = arith.maximumf %0, %10 : vector<8x128xf32>
    %12 = arith.mulf %0, %1 : vector<8x128xf32>
    %13 = arith.subf %11, %12 : vector<8x128xf32>
    %14 = math.log %7 : vector<8x128xf32>
    %15 = arith.addf %13, %14 : vector<8x128xf32>
    %cst_6 = arith.constant 0.000000e+00 : f32
    %16 = vector.broadcast %cst_6 : f32 to vector<8x128xf32>
    %17 = arith.cmpf oge, %0, %16 : vector<8x128xf32>
    %18 = arith.mulf %5, %9 : vector<8x128xf32>
    %19 = arith.select %17, %9, %18 : vector<8x128xi1>, vector<8x128xf32>
    %cst_7 = arith.constant dense<0.000000e+00> : vector<128xf32>
    %20 = vector.multi_reduction <add>, %15, %cst_7 [0] : vector<8x128xf32> to vector<128xf32>
    %c0_8 = arith.constant 0 : index
    %c0_9 = arith.constant 0 : index
    %c0_10 = arith.constant 0 : index
    %21 = vector.load %arg3[%c0_8, %c0_9, %c0_10] : memref<1x3x128xf32, #tpu.memory_space<vmem>>, vector<1x1x128xf32>
    %22 = vector.shape_cast %21 : vector<1x1x128xf32> to vector<128xf32>
    %23 = vector.shape_cast %20 : vector<128xf32> to vector<1x1x128xf32>
    tpu.vector_store %arg3[%c0_8, %c0_9, %c0_10], %23 {strides = array<i32>} : memref<1x3x128xf32, #tpu.memory_space<vmem>>, vector<1x1x128xf32>,
    %24 = arith.mulf %19, %1 : vector<8x128xf32>
    %cst_11 = arith.constant dense<0.000000e+00> : vector<128xf32>
    %25 = vector.multi_reduction <add>, %24, %cst_11 [0] : vector<8x128xf32> to vector<128xf32>
    %c0_12 = arith.constant 0 : index
    %c1 = arith.constant 1 : index
    %c0_13 = arith.constant 0 : index
    %26 = vector.load %arg3[%c0_12, %c1, %c0_13] : memref<1x3x128xf32, #tpu.memory_space<vmem>>, vector<1x1x128xf32>
    %27 = vector.shape_cast %26 : vector<1x1x128xf32> to vector<128xf32>
    %28 = vector.shape_cast %25 : vector<128xf32> to vector<1x1x128xf32>
    tpu.vector_store %arg3[%c0_12, %c1, %c0_13], %28 {strides = array<i32>} : memref<1x3x128xf32, #tpu.memory_space<vmem>>, vector<1x1x128xf32>,
    %29 = arith.addf %19, %1 : vector<8x128xf32>
    %cst_14 = arith.constant dense<0.000000e+00> : vector<128xf32>
    %30 = vector.multi_reduction <add>, %29, %cst_14 [0] : vector<8x128xf32> to vector<128xf32>
    %c0_15 = arith.constant 0 : index
    %c2 = arith.constant 2 : index
    %c0_16 = arith.constant 0 : index
    %31 = vector.load %arg3[%c0_15, %c2, %c0_16] : memref<1x3x128xf32, #tpu.memory_space<vmem>>, vector<1x1x128xf32>
    %32 = vector.shape_cast %31 : vector<1x1x128xf32> to vector<128xf32>
    %33 = vector.shape_cast %30 : vector<128xf32> to vector<1x1x128xf32>
    tpu.vector_store %arg3[%c0_15, %c2, %c0_16], %33 {strides = array<i32>} : memref<1x3x128xf32, #tpu.memory_space<vmem>>, vector<1x1x128xf32>,
    return
  }
  func.func @transform_0(%arg0: i32) -> (i32, i32) {
    %c0_i32 = arith.constant 0 : i32
    %c0_i32_0 = arith.constant 0 : i32
    return %arg0, %c0_i32 : i32, i32
  }
  func.func @transform_1(%arg0: i32) -> (i32, i32) {
    %c0_i32 = arith.constant 0 : i32
    %c0_i32_0 = arith.constant 0 : i32
    return %arg0, %c0_i32 : i32, i32
  }
  func.func @transform_2(%arg0: i32) -> (i32, i32, i32) {
    %c0_i32 = arith.constant 0 : i32
    %c0_i32_0 = arith.constant 0 : i32
    %c0_i32_1 = arith.constant 0 : i32
    return %arg0, %c0_i32, %c0_i32_0 : i32, i32, i32
  }
}

</mosaic_0001>

<bundles_post_ra>
// kernel: tpu_custom_call.1
= control target key start
LH: loop header
LB: loop body
LE: loop exit
PB: predicated region body
PF: predicated region fallthrough
CT: control target
= control target key end

     0   :  { %7 = vsyncpa [#allocation3], 0  ;;  %s659_s0 = inlined_call_operand.hbm [shape: f32[16,128], index: 0, kind: input, shape index: {}]   ;;  %s660_s1 = inlined_call_operand.hbm [shape: f32[16,128], index: 1, kind: input, shape index: {}]   ;;  %s661_s2 = inlined_call_operand.vmem [shape: f32[2,3,128], index: 2, kind: output, shape index: {}]  }
   0x1   :  { %9 = vsyncpa [#allocation3 + $0x1], 0 }
   0x2   :  { %10 = vsyncpa [#allocation5], 0 }
   0x3   :  { %12 = vsyncpa [#allocation5 + $0x1], 0  ;;  %s505_s9 = smov 0   ;;  %s507_s10 = smov 0  }
   0x4   :  { %s509_s11 = smov 0   ;;  %s511_s12 = smov 0  }
   0x5 LB: > { %s524_s13 = sadd.s32 4294967295, %s486_s12   ;;  %s527_s14 = sadd.s32 1, %s486_s12   ;;  %s486_s12 = sphi %s511_s12, %s673_s12   ;;  %s482_s11 = sphi %s509_s11, %s672_s11   ;;  %s478_s10 = sphi %s507_s10, %s671_s10   ;;  %s474_s9 = sphi %s505_s9, %s670_s9  }
   0x6   : > { %s22_s15 = ssub.s32 %s486_s12, %s527_s14  ;;  %s25_s16 = sadd.s32 1, %s482_s11 }
   0x7   : > { %p23_p0 = scmp.eq.s32.totalorder %s22_s15, 0  ;;  %p32_p1 = scmp.ne.s32.totalorder %s482_s11, %s478_s10 }
   0x8   : > { %p33_p2 = scmp.eq.s32.totalorder %s486_s12, 0  ;;  %p38_p3 = scmp.ne.s32.totalorder %s478_s10, %s474_s9 }
   0x9   : > { %s537_s17 = scalar_select %p23_p0, %s482_s11, %s25_s16  }
   0xa   : > { %p34_p4 = por %p33_p2, %p32_p1  ;;  %p39_p5 = scmp.eq.s32.totalorder %s524_s13, 0 }
   0xb   : > { %p349_p6 = scmp.lt.s32.totalorder %s486_s12, 2  ;;  %s546_s19 = sand.u32 1, %s482_s11  }
   0xc   : > { %p541_p7 = por %p39_p5, %p38_p3  ;;  %s328_s20 = sshll.u32 %s546_s19, 3 }
   0xd   : > { %s329_s21 = sshll.u32 %s486_s12, 7  ;;  %s118_s25 = scalar_lea.vmem [#allocation2], %s328_s20 }
   0xe   : > { %s663_s18 = scalar_select %p541_p7, 1, 0 }
   0xf   : > { %s555_s24 = scalar_lea.hbm %s659_s0, %s329_s21  ;;  %s125_s26 = sshll.u32 %s118_s25, 4  ;;  %s559_s26 = int_to_ptr.vmem [resolvable:$true] %s125_s26 }
  0x10   : > { %p561_p8 = pnand %p349_p6, %p34_p4  ;;  %s115_s28 = scalar_lea.sflag [#allocation3], %s546_s19 }
  0x11   : > { %s388_s29 = scalar_lea.hbm %s555_s24, 128  ;;  %s393_s4 = scalar_lea.hbm %s659_s0, 256 }
  0x12   : > { %p389_p11 = scmp.ne.s32.totalorder %s555_s24, %s388_s29  ;;  %p390_p12 = pneg %p561_p8 }
  0x13   : > { %p394_p1 = scmp.lt.u32.totalorder %s555_s24, %s659_s0  ;;  %p395_p2 = scmp.lt.u32.totalorder %s393_s4, %s388_s29 }
  0x14   : > { %p391_p13 = pnand %p390_p12, %p389_p11  ;;  %p397_p4 = scmp.lt.u32.totalorder %s388_s29, %s555_s24 }
  0x15   : > { %p396_p3 = por %p395_p2, %p394_p1 }
  0x16   : > { %p392_p0 = pneg %p391_p13 }
  0x17   : > { %p398_p5 = por %p397_p4, %p396_p3 }
  0x19   : > { %p399_p6 = pnand %p398_p5, %p392_p0 }
  0x1b   : > { %402 = shalt.err (!%p399_p6)
}
  0x1c   : > { %s403_s7 = scalar_lea.vmem %s559_s26, 128  ;;  %s488_s8 = smov [#allocation2]  }
  0x1d   : > { %p404_p11 = scmp.ne.s32.totalorder %s559_s26, %s403_s7  ;;  %s408_s9 = sshll.u32 %s488_s8, 4  ;;  %s409_s9 = int_to_ptr.vmem [resolvable:$false] %s408_s9 }
  0x1e   : > { %s410_s15 = scalar_lea.vmem %s409_s9, 256  ;;  %p411_p10 = scmp.lt.s32.totalorder %s559_s26, %s409_s9 }
  0x1f   : > { %p406_p13 = pnand %p404_p11, %p390_p12  ;;  %p412_p1 = scmp.lt.s32.totalorder %s410_s15, %s403_s7 }
  0x21   : > { %p407_p9 = pneg %p406_p13  ;;  %p413_p2 = por %p412_p1, %p411_p10 }
  0x23   : > { %p414_p3 = pnand %p413_p2, %p407_p9 }
  0x25   : > { %417 = shalt.err (!%p414_p3)
}
  0x26   : > { %345 = dma.hbm_to_vmem [thread:$0]  (!%p561_p8), %s555_s24, 128, %s559_s26, %s115_s28  }
  0x27   : > { %p665_p0 = scmp.lt.s32.totalorder %s486_s12, 3  ;;  %p666_p4 = scmp.ge.s32.totalorder %s486_s12, 1 }
  0x28   : > { %s606_s25 = scalar_lea.hbm %s660_s1, %s329_s21  ;;  %s136_s29 = scalar_lea.vmem [#allocation4], %s328_s20 }
  0x29   : > { %p597_p5 = pnand %p666_p4, %p665_p0  ;;  %s143_s30 = sshll.u32 %s136_s29, 4  ;;  %s144_s30 = int_to_ptr.vmem [resolvable:$true] %s143_s30 }
  0x2a   : > { %s133_s24 = scalar_lea.sflag [#allocation5], %s546_s19  ;;  %s418_s26 = scalar_lea.hbm %s606_s25, 128 }
  0x2b   : > { %s667_s16 = scalar_select %p597_p5, 1, 0 }
  0x2c   : > { %p419_p9 = scmp.ne.s32.totalorder %s606_s25, %s418_s26  ;;  %s423_s21 = scalar_lea.hbm %s660_s1, 256 }
  0x2d   : > { %p424_p11 = scmp.lt.u32.totalorder %s606_s25, %s660_s1  ;;  %p425_p13 = scmp.lt.u32.totalorder %s423_s21, %s418_s26 }
  0x2e   : > { %p421_p10 = pnand %p419_p9, %p390_p12  ;;  %p427_p2 = scmp.lt.u32.totalorder %s418_s26, %s606_s25 }
  0x2f   : > { %p426_p1 = por %p425_p13, %p424_p11 }
  0x30   : > { %p422_p6 = pneg %p421_p10 }
  0x31   : > { %p428_p3 = por %p427_p2, %p426_p1 }
  0x33   : > { %p429_p0 = pnand %p428_p3, %p422_p6 }
  0x35   : > { %432 = shalt.err (!%p429_p0)
}
  0x36   : > { %s433_s19 = scalar_lea.vmem %s144_s30, 128  ;;  %s489_s20 = smov [#allocation4]  }
  0x37   : > { %p434_p4 = scmp.ne.s32.totalorder %s144_s30, %s433_s19  ;;  %s438_s5 = sshll.u32 %s489_s20, 4  ;;  %s439_s5 = int_to_ptr.vmem [resolvable:$false] %s438_s5 }
  0x38   : > { %s440_s6 = scalar_lea.vmem %s439_s5, 256  ;;  %p441_p7 = scmp.lt.s32.totalorder %s144_s30, %s439_s5 }
  0x39   : > { %p436_p9 = pnand %p434_p4, %p390_p12  ;;  %p442_p5 = scmp.lt.s32.totalorder %s440_s6, %s433_s19 }
  0x3b   : > { %p437_p10 = pneg %p436_p9  ;;  %p443_p11 = por %p442_p5, %p441_p7 }
  0x3d   : > { %p444_p13 = pnand %p443_p11, %p437_p10 }
  0x3f   : > { %447 = shalt.err (!%p444_p13)
}
  0x40   : > { %348 = dma.hbm_to_vmem [thread:$0]  (!%p561_p8), %s606_s25, 128, %s144_s30, %s133_s24  }
  0x41   : > { %p668_p6 = scmp.ne.s32.totalorder %s667_s16, 0 }
  0x42   : > { %s154_s7 = sand.u32 (!%p668_p6), 1, %s478_s10   ;;  %p669_p12 = scmp.ne.s32.totalorder (!%p668_p6), %s663_s18, 0 }
  0x43   : > { %152 = sbr.rel (%p668_p6) target bundleno = 127 (0x7f), region = 28  ;;  %s333_s8 = sshll.u32 (!%p668_p6), %s154_s7, 3 }
  0x44   : > { %s155_s9 = scalar_lea.sflag (!%p668_p6), [#allocation3], %s154_s7  ;;  %s158_s15 = scalar_lea.vmem (!%p668_p6), [#allocation2], %s333_s8 }
  0x4a   : > { %465 = dma.done.wait (%p669_p12), %s155_s9, 128  }
  0x4b   : > { %467 = vsyncadd (%p669_p12), %s155_s9, 4294967168  ;;  %s164_s22 = scalar_lea.sflag [#allocation5], %s154_s7  ;;  %s167_s23 = scalar_lea.vmem [#allocation4], %s333_s8 }
  0x4c   : > { %469 = dma.done.wait (%p669_p12), %s164_s22, 128  }
  0x4d   : > { %471 = vsyncadd (%p669_p12), %s164_s22, 4294967168  ;;  %v196_v0 = vld [vmem:[%s158_s15] sm:$0xff]  ;;  %v197_v6 = vld [vmem:[%s167_s23] sm:$0xff]  ;;  %p192_p7 = scmp.lt.s32.totalorder %s524_s13, 1 }
  0x4e   : > { %v198_v1 = vand.u32 2147483647, %v196_v0  ;;  %v205_v7 = vmax.f32 %v196_v0, 0.0  ;;  %v206_v8 = vmul.f32 %v197_v6, %v196_v0  ;;  %vm211_vm0 = vcmp.ge.f32.partialorder %v196_v0, 0.0 }
  0x4f   : > { %s675_s13 = smov (!%p192_p7, %s524_s13), 1 }
  0x50   : > { %v199_v2 = vsub.f32 0.0, %v198_v1  ;;  %v207_v10 = vsub.f32 %v205_v7, %v206_v8  ;;  %s335_s18 = sshll.u32 %s675_s13, 2 }
  0x51   : > { %s195_s25 = scalar_lea.vmem %s661_s2, %s335_s18 }
  0x52   : > { %v200_v3 = vmul.f32 1.442695, %v199_v2 }
  0x54   : > { %382 = vpow2.f32 %v200_v3 }
  0x5e   : > { %v383_v4 = vpop.eup %382 }
  0x5f   : > { %v202_v5 = vadd.f32 1.0, %v383_v4 }
  0x61   : > { %384 = vrcp.f32 %v202_v5 }
  0x62   : > { %386 = vlog2.f32 %v202_v5 }
  0x6b   : > { %v385_v9 = vpop.eup %384 }
  0x6c   : > { %v387_v11 = vpop.eup %386  ;;  %v212_v12 = vmul.f32 %v385_v9, %v383_v4 }
  0x6d   : > { %v209_v13 = vmul.f32 0.6931472, %v387_v11 }
  0x6e   : > { %v213_v14 = vsel %vm211_vm0, %v385_v9, %v212_v12 }
  0x6f   : > { %v210_v15 = vadd.f32 %v209_v13, %v207_v10  ;;  %v221_v16 = vmul.f32 %v213_v14, %v197_v6  ;;  %v229_v17 = vadd.f32 %v213_v14, %v197_v6 }
  0x71   : > { %v214_v18 = vrot.slane %v210_v15, 4  ;;  %v222_v19 = vrot.slane %v221_v16, 4  ;;  %v230_v20 = vrot.slane %v229_v17, 4 }
  0x73   : > { %v215_v21 = vadd.f32 %v214_v18, %v210_v15  ;;  %v223_v22 = vadd.f32 %v222_v19, %v221_v16  ;;  %v231_v23 = vadd.f32 %v230_v20, %v229_v17 }
  0x75   : > { %v216_v24 = vrot.slane %v215_v21, 2  ;;  %v224_v25 = vrot.slane %v223_v22, 2  ;;  %v232_v26 = vrot.slane %v231_v23, 2 }
  0x77   : > { %v217_v27 = vadd.f32 %v216_v24, %v215_v21  ;;  %v225_v28 = vadd.f32 %v224_v25, %v223_v22  ;;  %v233_v29 = vadd.f32 %v232_v26, %v231_v23 }
  0x79   : > { %v218_v30 = vrot.slane %v217_v27, 1  ;;  %v226_v31 = vrot.slane %v225_v28, 1  ;;  %v234_v32 = vrot.slane %v233_v29, 1 }
  0x7b   : > { %v219_v33 = vadd.f32 %v218_v30, %v217_v27  ;;  %v227_v34 = vadd.f32 %v226_v31, %v225_v28  ;;  %v235_v35 = vadd.f32 %v234_v32, %v233_v29 }
  0x7d   : > { %220 = vst [vmem:[%s195_s25] sm:$0x1] %v219_v33  ;;  %228 = vst [vmem:[%s195_s25 + $0x1] sm:$0x1] %v227_v34 }
  0x7e   : > { %236 = vst [vmem:[%s195_s25 + $0x2] sm:$0x1] %v235_v35 }
  0x7f PF: > { %p15_p8 = scmp.ge.s32.totalorder %s527_s14, 4   ;;  %s670_s9 = smov %s478_s10 }
  0x80   : > { %s671_s10 = smov %s482_s11  ;;  %s672_s11 = smov %s537_s17 }
  0x81   : > { %s673_s12 = smov %s527_s14  ;;  %17 = sbr.rel (!%p15_p8) target bundleno = 5 (0x5), region = 81 }
  0x88   :  { %256 = vsyncpa [#allocation3], 1 }
  0x89   :  { %258 = vsyncpa [#allocation3 + $0x1], 1 }
  0x8a   :  { %259 = vsyncpa [#allocation5], 1 }
  0x8b   :  { %261 = vsyncpa [#allocation5 + $0x1], 1 }

</bundles_post_ra>
